<compile_context>
chip_gen: v5e
topology: v5e:2x2
jax: 0.10.0
libtpu: 0.0.40
codegen_flags: <defaults>
</compile_context>

<pallas_src>
import functools

import jax
import jax.numpy as jnp
from jax.experimental import pallas as pl


# ----------------------------- kernel -------------------------------------- #

def _main_block_kernel(x_ref, mask_ref, wres_ref, bres_ref, *rest, K, R):
    """Fused MainBlock.  Layout: channels on sublanes, batch*time on lanes."""
    o_ref = rest[-1]
    sub_refs = rest[:-1]

    x = x_ref[...]                                   # (Cin, B*T) f32
    BT = x.shape[1]
    pad_l = (K - 1) // 2

    # Residual path: 1x1 conv with BN folded in -> one MXU matmul.
    residual = (jnp.dot(wres_ref[...], x, preferred_element_type=jnp.float32)
                + bres_ref[...])

    h = x
    for r in range(R):
        wdw_ref, wpw_ref, bpw_ref = sub_refs[3 * r:3 * r + 3]

        # Depthwise 'same' FIR along time.  Center tap needs no mask; each
        # shifted tap is an explicit roll (two static slices + concat) whose
        # wrapped / cross-batch lanes are zeroed by the precomputed mask.
        acc = wdw_ref[pad_l] * h                     # (C,1) column splat
        for k in range(K):
            shift = k - pad_l
            if shift == 0:
                continue
            s = shift % BT
            win = jnp.concatenate([h[:, s:], h[:, :s]], axis=1)  # h[i+shift]
            acc = acc + wdw_ref[k] * (win * mask_ref[k])

        # Pointwise conv with BN + depthwise bias folded in (MXU) + bias.
        y = (jnp.dot(wpw_ref[...], acc, preferred_element_type=jnp.float32)
             + bpw_ref[...])
        if r == R - 1:
            y = y + residual                         # residual only on last
        h = jnp.maximum(y, 0.0)                      # ReLU

    o_ref[...] = h


# ----------------------------- wrappers ------------------------------------ #

def _fold_residual(params, eps=1e-5):
    s = params["bn_res_gamma"] / jnp.sqrt(params["bn_res_var"] + eps)
    w = s[:, None] * params["w_res"]
    b = s * (params["b_res"] - params["bn_res_mean"]) + params["bn_res_beta"]
    return w, b[:, None]


def _fold_subblock(p, eps=1e-5):
    s = p["gamma"] / jnp.sqrt(p["var"] + eps)
    w_pw = s[:, None] * p["w_pw"]
    # depthwise bias folded through the pointwise conv, then BN folded in
    b = s * (p["w_pw"] @ p["b_dw"] + p["b_pw"] - p["mean"]) + p["beta"]
    w_dw = jnp.transpose(p["w_dw"])[:, :, None]      # (K, C_in, 1) columns
    return w_dw, w_pw, b[:, None]


def main_block_forward(x, params, K):
    """Pallas implementation of MainBlock.forward (inference semantics)."""
    B, Cin, T = x.shape
    Cout = params["w_res"].shape[0]
    R = len(params["sub"])

    w_res, b_res = _fold_residual(params)
    sub_args = []
    for p in params["sub"]:
        sub_args.extend(_fold_subblock(p))

    # Per-tap validity masks for the depthwise 'same' conv on the
    # batch-flattened (C, B*T) layout: a lane is valid iff its shifted source
    # index stays inside the same batch segment of length T.
    pad_l = (K - 1) // 2
    t = jnp.arange(B * T, dtype=jnp.int32) % T
    masks = jnp.stack(
        [((t + (k - pad_l) >= 0) & (t + (k - pad_l) < T)).astype(jnp.float32)
         for k in range(K)])[:, None, :]             # (K, 1, B*T)

    # channels -> sublanes, batch*time -> lanes (single lane-dense block)
    xf = jnp.transpose(x, (1, 0, 2)).reshape(Cin, B * T)

    kernel = functools.partial(_main_block_kernel, K=K, R=R)
    out_f = pl.pallas_call(
        kernel,
        out_shape=jax.ShapeDtypeStruct((Cout, B * T), jnp.float32),
    )(xf, masks, w_res, b_res, *sub_args)

    return jnp.transpose(out_f.reshape(Cout, B, T), (1, 0, 2))


# ----------------------------- reference ----------------------------------- #

def _reference_forward(x, params, K, eps=1e-5):
    def bn(y, g, b, m, v):
        return ((y - m[None, :, None]) / jnp.sqrt(v[None, :, None] + eps)
                * g[None, :, None] + b[None, :, None])

    def pw(y, w, b):
        return jnp.einsum("oc,bct->bot", w, y) + b[None, :, None]

    def dw(y, w, b):
        T = y.shape[2]
        pad_total = K - 1
        pad_l = pad_total // 2
        yp = jnp.pad(y, ((0, 0), (0, 0), (pad_l, pad_total - pad_l)))
        out = jnp.zeros_like(y)
        for k in range(K):
            out = out + w[None, :, k, None] * yp[:, :, k:k + T]
        return out + b[None, :, None]

    res = bn(pw(x, params["w_res"], params["b_res"]),
             params["bn_res_gamma"], params["bn_res_beta"],
             params["bn_res_mean"], params["bn_res_var"])
    h = x
    n_sub = len(params["sub"])
    for i, p in enumerate(params["sub"]):
        h = pw(dw(h, p["w_dw"], p["b_dw"]), p["w_pw"], p["b_pw"])
        h = bn(h, p["gamma"], p["beta"], p["mean"], p["var"])
        if i + 1 == n_sub:
            h = h + res
        h = jnp.maximum(h, 0.0)
    return h


# ----------------------------- main ----------------------------------------- #

def _init_params(key, Cin, Cout, K, R):
    keys = iter(jax.random.split(key, 64))

    def rnd(shape, scale=0.2):
        return scale * jax.random.normal(next(keys), shape, jnp.float32)

    params = {
        "w_res": rnd((Cout, Cin)),
        "b_res": rnd((Cout,)),
        "bn_res_gamma": 1.0 + rnd((Cout,)),
        "bn_res_beta": rnd((Cout,)),
        "bn_res_mean": rnd((Cout,)),
        "bn_res_var": 1.0 + 0.1 * jnp.abs(jax.random.normal(next(keys), (Cout,))),
        "sub": [],
    }
    cin = Cin
    for _ in range(R):
        params["sub"].append({
            "w_dw": rnd((cin, K)),
            "b_dw": rnd((cin,)),
            "w_pw": rnd((Cout, cin)),
            "b_pw": rnd((Cout,)),
            "gamma": 1.0 + rnd((Cout,)),
            "beta": rnd((Cout,)),
            "mean": rnd((Cout,)),
            "var": 1.0 + 0.1 * jnp.abs(jax.random.normal(next(keys), (Cout,))),
        })
        cin = Cout
    return params


if __name__ == "__main__":
    B, Cin, Cout, T, K, R = 2, 8, 16, 128, 5, 2

    key = jax.random.PRNGKey(0)
    k_x, k_p = jax.random.split(key)
    x = jax.random.normal(k_x, (B, Cin, T), jnp.float32)
    params = _init_params(k_p, Cin, Cout, K, R)

    fwd = jax.jit(functools.partial(main_block_forward, K=K))
    out = jax.block_until_ready(fwd(x, params))
    ref = jax.block_until_ready(_reference_forward(x, params, K))

    assert out.shape == (B, Cout, T), out.shape
    assert jnp.allclose(out, ref, atol=1e-4, rtol=1e-4), (
        float(jnp.max(jnp.abs(out - ref))))
    print("KERNEL_OK")
</pallas_src>

<mosaic_0001>
module attributes {stable_mosaic.version = 11 : i64} {
  func.func @_main_block_kernel(%arg0: memref<8x256xf32, #tpu.memory_space<vmem>>, %arg1: memref<5x1x256xf32, #tpu.memory_space<vmem>>, %arg2: memref<16x8xf32, #tpu.memory_space<vmem>>, %arg3: memref<16x1xf32, #tpu.memory_space<vmem>>, %arg4: memref<5x8x1xf32, #tpu.memory_space<vmem>>, %arg5: memref<16x8xf32, #tpu.memory_space<vmem>>, %arg6: memref<16x1xf32, #tpu.memory_space<vmem>>, %arg7: memref<5x16x1xf32, #tpu.memory_space<vmem>>, %arg8: memref<16x16xf32, #tpu.memory_space<vmem>>, %arg9: memref<16x1xf32, #tpu.memory_space<vmem>>, %arg10: memref<16x256xf32, #tpu.memory_space<vmem>>) attributes {dimension_semantics = [], scalar_prefetch = 0 : i64, scratch_operands = 0 : i64, tpu.core_type = #tpu.core_type<tc>} {
    %c0 = arith.constant 0 : index
    %c0_0 = arith.constant 0 : index
    %0 = vector.load %arg0[%c0, %c0_0] : memref<8x256xf32, #tpu.memory_space<vmem>>, vector<8x256xf32>
    %c0_1 = arith.constant 0 : index
    %c0_2 = arith.constant 0 : index
    %1 = vector.load %arg2[%c0_1, %c0_2] : memref<16x8xf32, #tpu.memory_space<vmem>>, vector<16x8xf32>
    %cst = arith.constant dense<0.000000e+00> : vector<16x256xf32>
    %2 = tpu.matmul %1, %0, %cst {dimension_numbers = #tpu.dot_dimension_numbers<[1], [0], [0], [1], [0, 0, 1, 1], [], []>} : vector<16x8xf32>, vector<8x256xf32>, vector<16x256xf32> -> vector<16x256xf32>
    %c0_3 = arith.constant 0 : index
    %c0_4 = arith.constant 0 : index
    %3 = vector.load %arg3[%c0_3, %c0_4] : memref<16x1xf32, #tpu.memory_space<vmem>>, vector<16x1xf32>
    %4 = vector.broadcast %3 : vector<16x1xf32> to vector<16x256xf32>
    %5 = arith.addf %2, %4 : vector<16x256xf32>
    %c2 = arith.constant 2 : index
    %c0_5 = arith.constant 0 : index
    %c0_6 = arith.constant 0 : index
    %6 = vector.load %arg4[%c2, %c0_5, %c0_6] : memref<5x8x1xf32, #tpu.memory_space<vmem>>, vector<1x8x1xf32>
    %7 = vector.shape_cast %6 : vector<1x8x1xf32> to vector<8x1xf32>
    %8 = vector.broadcast %7 : vector<8x1xf32> to vector<8x256xf32>
    %9 = arith.mulf %8, %0 : vector<8x256xf32>
    %10 = vector.extract_strided_slice %0 {offsets = [0, 254], sizes = [8, 2], strides = [1, 1]} : vector<8x256xf32> to vector<8x2xf32>
    %11 = vector.extract_strided_slice %0 {offsets = [0, 0], sizes = [8, 254], strides = [1, 1]} : vector<8x256xf32> to vector<8x254xf32>
    %12 = tpu.concatenate %10, %11 in 1 : vector<8x2xf32>, vector<8x254xf32> -> vector<8x256xf32>
    %c0_7 = arith.constant 0 : index
    %c0_8 = arith.constant 0 : index
    %c0_9 = arith.constant 0 : index
    %13 = vector.load %arg4[%c0_7, %c0_8, %c0_9] : memref<5x8x1xf32, #tpu.memory_space<vmem>>, vector<1x8x1xf32>
    %14 = vector.shape_cast %13 : vector<1x8x1xf32> to vector<8x1xf32>
    %c0_10 = arith.constant 0 : index
    %c0_11 = arith.constant 0 : index
    %c0_12 = arith.constant 0 : index
    %15 = vector.load %arg1[%c0_10, %c0_11, %c0_12] : memref<5x1x256xf32, #tpu.memory_space<vmem>>, vector<1x1x256xf32>
    %16 = vector.shape_cast %15 : vector<1x1x256xf32> to vector<1x256xf32>
    %17 = vector.broadcast %16 : vector<1x256xf32> to vector<8x256xf32>
    %18 = arith.mulf %12, %17 : vector<8x256xf32>
    %19 = vector.broadcast %14 : vector<8x1xf32> to vector<8x256xf32>
    %20 = arith.mulf %19, %18 : vector<8x256xf32>
    %21 = arith.addf %9, %20 : vector<8x256xf32>
    %22 = vector.extract_strided_slice %0 {offsets = [0, 255], sizes = [8, 1], strides = [1, 1]} : vector<8x256xf32> to vector<8x1xf32>
    %23 = vector.extract_strided_slice %0 {offsets = [0, 0], sizes = [8, 255], strides = [1, 1]} : vector<8x256xf32> to vector<8x255xf32>
    %24 = tpu.concatenate %22, %23 in 1 : vector<8x1xf32>, vector<8x255xf32> -> vector<8x256xf32>
    %c1 = arith.constant 1 : index
    %c0_13 = arith.constant 0 : index
    %c0_14 = arith.constant 0 : index
    %25 = vector.load %arg4[%c1, %c0_13, %c0_14] : memref<5x8x1xf32, #tpu.memory_space<vmem>>, vector<1x8x1xf32>
    %26 = vector.shape_cast %25 : vector<1x8x1xf32> to vector<8x1xf32>
    %c1_15 = arith.constant 1 : index
    %c0_16 = arith.constant 0 : index
    %c0_17 = arith.constant 0 : index
    %27 = vector.load %arg1[%c1_15, %c0_16, %c0_17] : memref<5x1x256xf32, #tpu.memory_space<vmem>>, vector<1x1x256xf32>
    %28 = vector.shape_cast %27 : vector<1x1x256xf32> to vector<1x256xf32>
    %29 = vector.broadcast %28 : vector<1x256xf32> to vector<8x256xf32>
    %30 = arith.mulf %24, %29 : vector<8x256xf32>
    %31 = vector.broadcast %26 : vector<8x1xf32> to vector<8x256xf32>
    %32 = arith.mulf %31, %30 : vector<8x256xf32>
    %33 = arith.addf %21, %32 : vector<8x256xf32>
    %34 = vector.extract_strided_slice %0 {offsets = [0, 1], sizes = [8, 255], strides = [1, 1]} : vector<8x256xf32> to vector<8x255xf32>
    %35 = vector.extract_strided_slice %0 {offsets = [0, 0], sizes = [8, 1], strides = [1, 1]} : vector<8x256xf32> to vector<8x1xf32>
    %36 = tpu.concatenate %34, %35 in 1 : vector<8x255xf32>, vector<8x1xf32> -> vector<8x256xf32>
    %c3 = arith.constant 3 : index
    %c0_18 = arith.constant 0 : index
    %c0_19 = arith.constant 0 : index
    %37 = vector.load %arg4[%c3, %c0_18, %c0_19] : memref<5x8x1xf32, #tpu.memory_space<vmem>>, vector<1x8x1xf32>
    %38 = vector.shape_cast %37 : vector<1x8x1xf32> to vector<8x1xf32>
    %c3_20 = arith.constant 3 : index
    %c0_21 = arith.constant 0 : index
    %c0_22 = arith.constant 0 : index
    %39 = vector.load %arg1[%c3_20, %c0_21, %c0_22] : memref<5x1x256xf32, #tpu.memory_space<vmem>>, vector<1x1x256xf32>
    %40 = vector.shape_cast %39 : vector<1x1x256xf32> to vector<1x256xf32>
    %41 = vector.broadcast %40 : vector<1x256xf32> to vector<8x256xf32>
    %42 = arith.mulf %36, %41 : vector<8x256xf32>
    %43 = vector.broadcast %38 : vector<8x1xf32> to vector<8x256xf32>
    %44 = arith.mulf %43, %42 : vector<8x256xf32>
    %45 = arith.addf %33, %44 : vector<8x256xf32>
    %46 = vector.extract_strided_slice %0 {offsets = [0, 2], sizes = [8, 254], strides = [1, 1]} : vector<8x256xf32> to vector<8x254xf32>
    %47 = vector.extract_strided_slice %0 {offsets = [0, 0], sizes = [8, 2], strides = [1, 1]} : vector<8x256xf32> to vector<8x2xf32>
    %48 = tpu.concatenate %46, %47 in 1 : vector<8x254xf32>, vector<8x2xf32> -> vector<8x256xf32>
    %c4 = arith.constant 4 : index
    %c0_23 = arith.constant 0 : index
    %c0_24 = arith.constant 0 : index
    %49 = vector.load %arg4[%c4, %c0_23, %c0_24] : memref<5x8x1xf32, #tpu.memory_space<vmem>>, vector<1x8x1xf32>
    %50 = vector.shape_cast %49 : vector<1x8x1xf32> to vector<8x1xf32>
    %c4_25 = arith.constant 4 : index
    %c0_26 = arith.constant 0 : index
    %c0_27 = arith.constant 0 : index
    %51 = vector.load %arg1[%c4_25, %c0_26, %c0_27] : memref<5x1x256xf32, #tpu.memory_space<vmem>>, vector<1x1x256xf32>
    %52 = vector.shape_cast %51 : vector<1x1x256xf32> to vector<1x256xf32>
    %53 = vector.broadcast %52 : vector<1x256xf32> to vector<8x256xf32>
    %54 = arith.mulf %48, %53 : vector<8x256xf32>
    %55 = vector.broadcast %50 : vector<8x1xf32> to vector<8x256xf32>
    %56 = arith.mulf %55, %54 : vector<8x256xf32>
    %57 = arith.addf %45, %56 : vector<8x256xf32>
    %c0_28 = arith.constant 0 : index
    %c0_29 = arith.constant 0 : index
    %58 = vector.load %arg5[%c0_28, %c0_29] : memref<16x8xf32, #tpu.memory_space<vmem>>, vector<16x8xf32>
    %cst_30 = arith.constant dense<0.000000e+00> : vector<16x256xf32>
    %59 = tpu.matmul %58, %57, %cst_30 {dimension_numbers = #tpu.dot_dimension_numbers<[1], [0], [0], [1], [0, 0, 1, 1], [], []>} : vector<16x8xf32>, vector<8x256xf32>, vector<16x256xf32> -> vector<16x256xf32>
    %c0_31 = arith.constant 0 : index
    %c0_32 = arith.constant 0 : index
    %60 = vector.load %arg6[%c0_31, %c0_32] : memref<16x1xf32, #tpu.memory_space<vmem>>, vector<16x1xf32>
    %61 = vector.broadcast %60 : vector<16x1xf32> to vector<16x256xf32>
    %62 = arith.addf %59, %61 : vector<16x256xf32>
    %cst_33 = arith.constant 0.000000e+00 : f32
    %63 = vector.broadcast %cst_33 : f32 to vector<16x256xf32>
    %64 = arith.maximumf %62, %63 : vector<16x256xf32>
    %c2_34 = arith.constant 2 : index
    %c0_35 = arith.constant 0 : index
    %c0_36 = arith.constant 0 : index
    %65 = vector.load %arg7[%c2_34, %c0_35, %c0_36] : memref<5x16x1xf32, #tpu.memory_space<vmem>>, vector<1x16x1xf32>
    %66 = vector.shape_cast %65 : vector<1x16x1xf32> to vector<16x1xf32>
    %67 = vector.broadcast %66 : vector<16x1xf32> to vector<16x256xf32>
    %68 = arith.mulf %67, %64 : vector<16x256xf32>
    %69 = vector.extract_strided_slice %64 {offsets = [0, 254], sizes = [16, 2], strides = [1, 1]} : vector<16x256xf32> to vector<16x2xf32>
    %70 = vector.extract_strided_slice %64 {offsets = [0, 0], sizes = [16, 254], strides = [1, 1]} : vector<16x256xf32> to vector<16x254xf32>
    %71 = tpu.concatenate %69, %70 in 1 : vector<16x2xf32>, vector<16x254xf32> -> vector<16x256xf32>
    %c0_37 = arith.constant 0 : index
    %c0_38 = arith.constant 0 : index
    %c0_39 = arith.constant 0 : index
    %72 = vector.load %arg7[%c0_37, %c0_38, %c0_39] : memref<5x16x1xf32, #tpu.memory_space<vmem>>, vector<1x16x1xf32>
    %73 = vector.shape_cast %72 : vector<1x16x1xf32> to vector<16x1xf32>
    %c0_40 = arith.constant 0 : index
    %c0_41 = arith.constant 0 : index
    %c0_42 = arith.constant 0 : index
    %74 = vector.load %arg1[%c0_40, %c0_41, %c0_42] : memref<5x1x256xf32, #tpu.memory_space<vmem>>, vector<1x1x256xf32>
    %75 = vector.shape_cast %74 : vector<1x1x256xf32> to vector<1x256xf32>
    %76 = vector.broadcast %75 : vector<1x256xf32> to vector<16x256xf32>
    %77 = arith.mulf %71, %76 : vector<16x256xf32>
    %78 = vector.broadcast %73 : vector<16x1xf32> to vector<16x256xf32>
    %79 = arith.mulf %78, %77 : vector<16x256xf32>
    %80 = arith.addf %68, %79 : vector<16x256xf32>
    %81 = vector.extract_strided_slice %64 {offsets = [0, 255], sizes = [16, 1], strides = [1, 1]} : vector<16x256xf32> to vector<16x1xf32>
    %82 = vector.extract_strided_slice %64 {offsets = [0, 0], sizes = [16, 255], strides = [1, 1]} : vector<16x256xf32> to vector<16x255xf32>
    %83 = tpu.concatenate %81, %82 in 1 : vector<16x1xf32>, vector<16x255xf32> -> vector<16x256xf32>
    %c1_43 = arith.constant 1 : index
    %c0_44 = arith.constant 0 : index
    %c0_45 = arith.constant 0 : index
    %84 = vector.load %arg7[%c1_43, %c0_44, %c0_45] : memref<5x16x1xf32, #tpu.memory_space<vmem>>, vector<1x16x1xf32>
    %85 = vector.shape_cast %84 : vector<1x16x1xf32> to vector<16x1xf32>
    %c1_46 = arith.constant 1 : index
    %c0_47 = arith.constant 0 : index
    %c0_48 = arith.constant 0 : index
    %86 = vector.load %arg1[%c1_46, %c0_47, %c0_48] : memref<5x1x256xf32, #tpu.memory_space<vmem>>, vector<1x1x256xf32>
    %87 = vector.shape_cast %86 : vector<1x1x256xf32> to vector<1x256xf32>
    %88 = vector.broadcast %87 : vector<1x256xf32> to vector<16x256xf32>
    %89 = arith.mulf %83, %88 : vector<16x256xf32>
    %90 = vector.broadcast %85 : vector<16x1xf32> to vector<16x256xf32>
    %91 = arith.mulf %90, %89 : vector<16x256xf32>
    %92 = arith.addf %80, %91 : vector<16x256xf32>
    %93 = vector.extract_strided_slice %64 {offsets = [0, 1], sizes = [16, 255], strides = [1, 1]} : vector<16x256xf32> to vector<16x255xf32>
    %94 = vector.extract_strided_slice %64 {offsets = [0, 0], sizes = [16, 1], strides = [1, 1]} : vector<16x256xf32> to vector<16x1xf32>
    %95 = tpu.concatenate %93, %94 in 1 : vector<16x255xf32>, vector<16x1xf32> -> vector<16x256xf32>
    %c3_49 = arith.constant 3 : index
    %c0_50 = arith.constant 0 : index
    %c0_51 = arith.constant 0 : index
    %96 = vector.load %arg7[%c3_49, %c0_50, %c0_51] : memref<5x16x1xf32, #tpu.memory_space<vmem>>, vector<1x16x1xf32>
    %97 = vector.shape_cast %96 : vector<1x16x1xf32> to vector<16x1xf32>
    %c3_52 = arith.constant 3 : index
    %c0_53 = arith.constant 0 : index
    %c0_54 = arith.constant 0 : index
    %98 = vector.load %arg1[%c3_52, %c0_53, %c0_54] : memref<5x1x256xf32, #tpu.memory_space<vmem>>, vector<1x1x256xf32>
    %99 = vector.shape_cast %98 : vector<1x1x256xf32> to vector<1x256xf32>
    %100 = vector.broadcast %99 : vector<1x256xf32> to vector<16x256xf32>
    %101 = arith.mulf %95, %100 : vector<16x256xf32>
    %102 = vector.broadcast %97 : vector<16x1xf32> to vector<16x256xf32>
    %103 = arith.mulf %102, %101 : vector<16x256xf32>
    %104 = arith.addf %92, %103 : vector<16x256xf32>
    %105 = vector.extract_strided_slice %64 {offsets = [0, 2], sizes = [16, 254], strides = [1, 1]} : vector<16x256xf32> to vector<16x254xf32>
    %106 = vector.extract_strided_slice %64 {offsets = [0, 0], sizes = [16, 2], strides = [1, 1]} : vector<16x256xf32> to vector<16x2xf32>
    %107 = tpu.concatenate %105, %106 in 1 : vector<16x254xf32>, vector<16x2xf32> -> vector<16x256xf32>
    %c4_55 = arith.constant 4 : index
    %c0_56 = arith.constant 0 : index
    %c0_57 = arith.constant 0 : index
    %108 = vector.load %arg7[%c4_55, %c0_56, %c0_57] : memref<5x16x1xf32, #tpu.memory_space<vmem>>, vector<1x16x1xf32>
    %109 = vector.shape_cast %108 : vector<1x16x1xf32> to vector<16x1xf32>
    %c4_58 = arith.constant 4 : index
    %c0_59 = arith.constant 0 : index
    %c0_60 = arith.constant 0 : index
    %110 = vector.load %arg1[%c4_58, %c0_59, %c0_60] : memref<5x1x256xf32, #tpu.memory_space<vmem>>, vector<1x1x256xf32>
    %111 = vector.shape_cast %110 : vector<1x1x256xf32> to vector<1x256xf32>
    %112 = vector.broadcast %111 : vector<1x256xf32> to vector<16x256xf32>
    %113 = arith.mulf %107, %112 : vector<16x256xf32>
    %114 = vector.broadcast %109 : vector<16x1xf32> to vector<16x256xf32>
    %115 = arith.mulf %114, %113 : vector<16x256xf32>
    %116 = arith.addf %104, %115 : vector<16x256xf32>
    %c0_61 = arith.constant 0 : index
    %c0_62 = arith.constant 0 : index
    %117 = vector.load %arg8[%c0_61, %c0_62] : memref<16x16xf32, #tpu.memory_space<vmem>>, vector<16x16xf32>
    %cst_63 = arith.constant dense<0.000000e+00> : vector<16x256xf32>
    %118 = tpu.matmul %117, %116, %cst_63 {dimension_numbers = #tpu.dot_dimension_numbers<[1], [0], [0], [1], [0, 0, 1, 1], [], []>} : vector<16x16xf32>, vector<16x256xf32>, vector<16x256xf32> -> vector<16x256xf32>
    %c0_64 = arith.constant 0 : index
    %c0_65 = arith.constant 0 : index
    %119 = vector.load %arg9[%c0_64, %c0_65] : memref<16x1xf32, #tpu.memory_space<vmem>>, vector<16x1xf32>
    %120 = vector.broadcast %119 : vector<16x1xf32> to vector<16x256xf32>
    %121 = arith.addf %118, %120 : vector<16x256xf32>
    %122 = arith.addf %121, %5 : vector<16x256xf32>
    %cst_66 = arith.constant 0.000000e+00 : f32
    %123 = vector.broadcast %cst_66 : f32 to vector<16x256xf32>
    %124 = arith.maximumf %122, %123 : vector<16x256xf32>
    %c0_67 = arith.constant 0 : index
    %c0_68 = arith.constant 0 : index
    %125 = vector.load %arg10[%c0_67, %c0_68] : memref<16x256xf32, #tpu.memory_space<vmem>>, vector<16x256xf32>
    tpu.vector_store %arg10[%c0_67, %c0_68], %124 {strides = array<i32>} : memref<16x256xf32, #tpu.memory_space<vmem>>, vector<16x256xf32>,
    return
  }
}

</mosaic_0001>

<bundles_post_ra>
// kernel: main_block_forward.1
= control target key start
LH: loop header
LB: loop body
LE: loop exit
PB: predicated region body
PF: predicated region fallthrough
CT: control target
= control target key end

     0   :  { %v615_v0 = vmov 0   ;;  %s616_s17 = smov 1   ;;  %s617_s20 = smov 2   ;;  %vm51_vm0 = vcmask 64512   ;;  %vm120_vm1 = vcmask 15360   ;;  %vm148_vm2 = vcmask 7168   ;;  %s938_s4 = inlined_call_operand.vmem [shape: f32[5,8,1], index: 4, kind: input, shape index: {}]   ;;  %s939_s0 = inlined_call_operand.vmem [shape: f32[8,256], index: 0, kind: input, shape index: {}]   ;;  %s940_s6 = inlined_call_operand.vmem [shape: f32[16,1], index: 6, kind: input, shape index: {}]   ;;  %s941_s7 = inlined_call_operand.vmem [shape: f32[5,16,1], index: 7, kind: input, shape index: {}]   ;;  %s942_s2 = inlined_call_operand.vmem [shape: f32[16,8], index: 2, kind: input, shape index: {}]   ;;  %s943_s1 = inlined_call_operand.vmem [shape: f32[5,1,256], index: 1, kind: input, shape index: {}]   ;;  %s944_s5 = inlined_call_operand.vmem [shape: f32[16,8], index: 5, kind: input, shape index: {}]   ;;  %s945_s3 = inlined_call_operand.vmem [shape: f32[16,1], index: 3, kind: input, shape index: {}]   ;;  %s946_s9 = inlined_call_operand.vmem [shape: f32[16,1], index: 9, kind: input, shape index: {}]   ;;  %s947_s8 = inlined_call_operand.vmem [shape: f32[16,16], index: 8, kind: input, shape index: {}]   ;;  %s948_s10 = inlined_call_operand.vmem [shape: f32[16,256], index: 10, kind: output, shape index: {}]  }
   0x1   :  { %612 = vset.pattern.permute.xlu2 %v615_v0  ;;  %v582_v1 = vld [vmem:[%s938_s4 + $0x10] sm:$0xff]  ;;  %v681_v2 = vld [vmem:[%s939_s0 + $0x8] sm:$0xff]  ;;  %613 = vset.pattern.permute.xlu0 %v615_v0  ;;  %v688_v3 = vld [vmem:[%s939_s0] sm:$0xff]  ;;  %s618_s24 = smov 127   ;;  %s619_s27 = smov 126   ;;  %vm177_vm3 = vcmask 1039360  }
   0x2   :  { %108 = vperm.xlu2 %612, %v582_v1   ;;  %143 = vrot.lane.b32.xlu1 %v681_v2, %s616_s17  ;;  %v125_v4 = vld [vmem:[%s938_s4] sm:$0xff]  ;;  %v583_v5 = vld [vmem:[%s938_s4 + $0x8] sm:$0xff]  ;;  %v585_v6 = vld [vmem:[%s938_s4 + $0x18] sm:$0xff]  ;;  %vm207_vm4 = vcmask 1031168   ;;  %vm509_vm5 = vcmask 130048  }
   0x3   :  { %114 = vrot.lane.b32.xlu0 %v681_v2, %s617_s20  ;;  %605 = vmatpush.msra.mxu2 %v688_v3  ;;  %v235_v7 = vld [vmem:[%s940_s6] sm:$0xff]  ;;  %v343_v9 = vld [vmem:[%s941_s7 + $0x8] sm:$0xff]  ;;  %v596_v10 = vld [vmem:[%s941_s7 + $0x18] sm:$0xff] }
   0x4   :  { %606 = vmatpush.msra.mxu3 %v681_v2  ;;  %614 = vset.pattern.permute.xlu1 %v615_v0  ;;  %v587_v8 = vld [vmem:[%s938_s4 + $0x20] sm:$0xff]  ;;  %v598_v12 = vld [vmem:[%s941_s7 + $0x38] sm:$0xff]  ;;  %v595_v13 = vld [vmem:[%s941_s7 + $0x10] sm:$0xff] }
   0x5   :  { %73 = vmatpush.msra.mxu0 %v688_v3  ;;  %96 = vmatpush.msra.mxu1 %v681_v2  ;;  %v342_v11 = vld [vmem:[%s941_s7] sm:$0xff]  ;;  %v38_v14 = vld [vmem:[%s942_s2 + $0x8] sm:$0xff] }
   0x6   :  { %579 = vmatmul.msk.f32.vlgmr.msra.gmra.mxu2 %vm51_vm0, %v38_v14  ;;  %581 = vmatmul.msk.f32.vlgmr.msra.gmra.mxu3 %vm51_vm0, %v38_v14  ;;  %v236_v21 = vld [vmem:[%s940_s6 + $0x8] sm:$0xff]  ;;  %v126_v22 = vld [vmem:[%s943_s1] sm:$0x3]  ;;  %v584_v31 = vld [vmem:[%s943_s1 + $0x2] sm:$0x3] }
   0x7   :  { %v749_v23 = vperm.slane %v126_v22, 0  ;;  %v751_v24 = vperm.slane %v126_v22, 1  ;;  %v594_v29 = vld [vmem:[%s941_s7 + $0x28] sm:$0xff]  ;;  %v586_v32 = vld [vmem:[%s943_s1 + $0x6] sm:$0x3]  ;;  %v766_v35 = vperm.slane %v584_v31, 0 }
   0x8   :  { %v768_v36 = vperm.slane %v584_v31, 1  ;;  %v770_v37 = vperm.slane %v586_v32, 0  ;;  %v772_v38 = vperm.slane %v586_v32, 1  ;;  %v593_v43 = vld [vmem:[%s941_s7 + $0x20] sm:$0xff]  ;;  %v588_v48 = vld [vmem:[%s943_s1 + $0x8] sm:$0x3] }
   0x9   :  { %v790_v57 = vperm.slane %v588_v48, 0  ;;  %v792_v58 = vperm.slane %v588_v48, 1  ;;  %v234_v14 = vld [vmem:[%s944_s5 + $0x8] sm:$0xff] }
   0xa   :  { %136 = vperm.xlu2 %612, %v125_v4   ;;  %146 = vrot.lane.b32.xlu1 %v688_v3, %s616_s17 }
   0xb   :  { %118 = vrot.lane.b32.xlu0 %v688_v3, %s617_s20 }
  0x12   :  { %166 = vperm.xlu2 %612, %v583_v5   ;;  %175 = vrot.lane.b32.xlu1 %v681_v2, %s618_s24 }
  0x13   :  { %173 = vrot.lane.b32.xlu0 %v688_v3, %s618_s24 }
  0x1a   :  { %196 = vperm.xlu2 %612, %v585_v6   ;;  %205 = vrot.lane.b32.xlu1 %v681_v2, %s619_s27 }
  0x1b   :  { %203 = vrot.lane.b32.xlu0 %v688_v3, %s619_s27 }
  0x22   :  { %239 = vperm.xlu2 %612, %v235_v7   ;;  %244 = vperm.xlu1 %614, %v236_v21  }
  0x23   :  { %226 = vperm.xlu0 %613, %v587_v8  }
  0x2a   :  { %355 = vperm.xlu2 %612, %v343_v9   ;;  %313 = vperm.xlu1 %614, %v594_v29  }
  0x2b   :  { %398 = vperm.xlu0 %613, %v596_v10  }
  0x32   :  { %350 = vperm.xlu2 %612, %v342_v11   ;;  %308 = vperm.xlu1 %614, %v593_v43   ;;  %v498_v43 = vld [vmem:[%s946_s9 + $0x8] sm:$0xff] }
  0x33   :  { %441 = vperm.xlu0 %613, %v598_v12  }
  0x3a   :  { %393 = vperm.xlu2 %612, %v595_v13   ;;  %v233_v13 = vld [vmem:[%s944_s5] sm:$0xff] }
  0x5c   :  { %v109_v15 = vpop.permute.xlu2 %108 }
  0x5d   :  { %v111_v46 = vmul.f32 %v109_v15, %v688_v3  ;;  %v112_v47 = vmul.f32 %v109_v15, %v681_v2 }
  0x64   :  { %v137_v19 = vpop.permute.xlu2 %136 }
  0x6c   :  { %v167_v30 = vpop.permute.xlu2 %166 }
  0x74   :  { %v144_v16 = vpop.permute.xlu1 %143  ;;  %v197_v59 = vpop.permute.xlu2 %196 }
  0x75   :  { %v115_v17 = vpop.permute.xlu0 %114 }
  0x7c   :  { %v147_v18 = vpop.permute.xlu1 %146 }
  0x7d   :  { %v119_v20 = vpop.permute.xlu0 %118  ;;  %v149_v39 = vsel %vm148_vm2, %v147_v18, %v144_v16  ;;  %v152_v40 = vsel %vm148_vm2, %v144_v16, %v147_v18 }
  0x7e   :  { %v121_v26 = vsel %vm120_vm1, %v119_v20, %v115_v17  ;;  %v124_v27 = vsel %vm120_vm1, %v115_v17, %v119_v20  ;;  %v162_v50 = vmul.f32 %v766_v35, %v152_v40  ;;  %v163_v51 = vmul.f32 %v768_v36, %v149_v39  ;;  %v240_v17 = vpop.permute.xlu2 %239  ;;  %v599_v39 = vld [vmem:[%s941_s7 + $0x40] sm:$0xff] }
  0x7f   :  { %v132_v33 = vmul.f32 %v749_v23, %v124_v27  ;;  %v133_v34 = vmul.f32 %v751_v24, %v121_v26  ;;  %v37_v26 = vld [vmem:[%s942_s2] sm:$0xff] }
  0x80   :  { %v169_v62 = vmul.f32 %v167_v30, %v162_v50  ;;  %v170_v63 = vmul.f32 %v167_v30, %v163_v51  ;;  %578 = vmatmul.msk.f32.vlgmr.msra.gmra.mxu0 %vm51_vm0, %v37_v26  ;;  %580 = vmatmul.msk.f32.vlgmr.msra.gmra.mxu1 %vm51_vm0, %v37_v26  ;;  %v39_v40 = vld [vmem:[%s945_s3] sm:$0xff] }
  0x81   :  { %v139_v44 = vmul.f32 %v137_v19, %v132_v33  ;;  %v140_v45 = vmul.f32 %v137_v19, %v133_v34  ;;  %v597_v34 = vld [vmem:[%s941_s7 + $0x30] sm:$0xff] }
  0x83   :  { %v141_v55 = vadd.f32 %v139_v44, %v111_v46  ;;  %v142_v56 = vadd.f32 %v140_v45, %v112_v47  ;;  %v40_v44 = vld [vmem:[%s945_s3 + $0x8] sm:$0xff] }
  0x84   :  { %v176_v25 = vpop.permute.xlu1 %175 }
  0x85   :  { %v174_v28 = vpop.permute.xlu0 %173  ;;  %v171_v4 = vadd.f32 %v169_v62, %v141_v55  ;;  %v172_v5 = vadd.f32 %v170_v63, %v142_v56 }
  0x86   :  { %v178_v41 = vsel %vm177_vm3, %v174_v28, %v176_v25  ;;  %v182_v42 = vsel %vm177_vm3, %v176_v25, %v174_v28  ;;  %v356_v45 = vpop.permute.xlu2 %355 }
  0x87   :  { %v192_v52 = vmul.f32 %v770_v37, %v178_v41  ;;  %v193_v53 = vmul.f32 %v772_v38, %v182_v42  ;;  %v497_v41 = vld [vmem:[%s946_s9] sm:$0xff]  ;;  %v600_v42 = vld [vmem:[%s941_s7 + $0x48] sm:$0xff] }
  0x89   :  { %v199_v0 = vmul.f32 %v197_v59, %v192_v52  ;;  %v200_v1 = vmul.f32 %v197_v59, %v193_v53  ;;  %v808_v15 = vpop.f32.mrf.mxu2  ;;  %v810_v16 = vpop.f32.mrf.mxu3 }
  0x8b   :  { %v201_v9 = vadd.f32 %v199_v0, %v171_v4  ;;  %v202_v10 = vadd.f32 %v200_v1, %v172_v5 }
  0x8c   :  { %v206_v54 = vpop.permute.xlu1 %205 }
  0x8d   :  { %v204_v49 = vpop.permute.xlu0 %203 }
  0x8e   :  { %v208_v60 = vsel %vm207_vm4, %v204_v49, %v206_v54  ;;  %v212_v61 = vsel %vm207_vm4, %v206_v54, %v204_v49  ;;  %v351_v46 = vpop.permute.xlu2 %350 }
  0x8f   :  { %v222_v2 = vmul.f32 %v790_v57, %v208_v60  ;;  %v223_v3 = vmul.f32 %v792_v58, %v212_v61 }
  0x94   :  { %v245_v28 = vpop.permute.xlu1 %244 }
  0x95   :  { %v227_v6 = vpop.permute.xlu0 %226 }
  0x96   :  { %v229_v7 = vmul.f32 %v227_v6, %v222_v2  ;;  %v230_v8 = vmul.f32 %v227_v6, %v223_v3  ;;  %v394_v49 = vpop.permute.xlu2 %393 }
  0x98   :  { %v231_v11 = vadd.f32 %v229_v7, %v201_v9  ;;  %v232_v12 = vadd.f32 %v230_v8, %v202_v10 }
  0x9a   :  { %268 = vmatpush.msrb.mxu2 %v231_v11  ;;  %291 = vmatpush.msrb.mxu3 %v232_v12 }
  0x9b   :  { %589 = vmatmul.msk.f32.vlgmr.msrb.gmra.mxu2 %vm51_vm0, %v233_v13  ;;  %591 = vmatmul.msk.f32.vlgmr.msrb.gmra.mxu3 %vm51_vm0, %v233_v13 }
  0x9c   :  { %v314_v48 = vpop.permute.xlu1 %313 }
  0x9d   :  { %v399_v47 = vpop.permute.xlu0 %398 }
  0xa3   :  { %590 = vmatmul.msk.f32.gmra.mxu2 %vm51_vm0, %v234_v14  ;;  %592 = vmatmul.msk.f32.gmra.mxu3 %vm51_vm0, %v234_v14 }
  0xa4   :  { %v309_v51 = vpop.permute.xlu1 %308 }
  0xa5   :  { %v878_v50 = vpop.permute.xlu0 %441 }
 0x11e   :  { %v270_v18 = vpop.f32.mrf.mxu2  ;;  %v293_v19 = vpop.f32.mrf.mxu3 }
 0x11f   :  { %v271_v20 = vadd.f32 %v270_v18, %v240_v17  ;;  %v294_v21 = vadd.f32 %v293_v19, %v240_v17 }
 0x121   :  { %v812_v22 = vmax.f32 %v271_v20, 0.0  ;;  %v814_v25 = vmax.f32 %v294_v21, 0.0 }
 0x123   :  { %411 = vrot.lane.b32.xlu2 %v814_v25, %s618_s24  ;;  %322 = vrot.lane.b32.xlu0 %v814_v25, %s617_s20 }
 0x124   :  { %330 = vrot.lane.b32.xlu1 %v812_v22, %s617_s20 }
 0x126   :  { %v273_v27 = vpop.f32.mrf.mxu2  ;;  %v296_v31 = vpop.f32.mrf.mxu3 }
 0x127   :  { %v274_v29 = vadd.f32 %v273_v27, %v245_v28  ;;  %v297_v32 = vadd.f32 %v296_v31, %v245_v28 }
 0x129   :  { %v833_v30 = vmax.f32 %v274_v29, 0.0  ;;  %v841_v33 = vmax.f32 %v297_v32, 0.0  ;;  %v316_v32 = vmul.f32 %v309_v51, %v812_v22 }
 0x12b   :  { %454 = vrot.lane.b32.xlu2 %v814_v25, %s619_s27  ;;  %366 = vrot.lane.b32.xlu0 %v814_v25, %s616_s17 }
 0x12c   :  { %372 = vrot.lane.b32.xlu1 %v812_v22, %s616_s17 }
 0x133   :  { %374 = vrot.lane.b32.xlu0 %v833_v30, %s616_s17  ;;  %332 = vrot.lane.b32.xlu2 %v833_v30, %s617_s20 }
 0x134   :  { %409 = vrot.lane.b32.xlu1 %v812_v22, %s618_s24 }
 0x13b   :  { %415 = vrot.lane.b32.xlu0 %v841_v33, %s618_s24  ;;  %368 = vrot.lane.b32.xlu2 %v841_v33, %s616_s17 }
 0x13c   :  { %452 = vrot.lane.b32.xlu1 %v812_v22, %s619_s27 }
 0x143   :  { %456 = vrot.lane.b32.xlu0 %v833_v30, %s619_s27  ;;  %413 = vrot.lane.b32.xlu2 %v833_v30, %s618_s24 }
 0x144   :  { %324 = vrot.lane.b32.xlu1 %v841_v33, %s617_s20 }
 0x14b   :  { %436 = vperm.xlu0 %613, %v597_v34   ;;  %479 = vperm.xlu2 %612, %v599_v39   ;;  %v317_v34 = vmul.f32 %v309_v51, %v814_v25 }
 0x14c   :  { %458 = vrot.lane.b32.xlu1 %v841_v33, %s619_s27 }
 0x153   :  { %43 = vperm.xlu0 %613, %v39_v40   ;;  %501 = vperm.xlu2 %612, %v497_v41  }
 0x154   :  { %484 = vperm.xlu1 %614, %v600_v42  }
 0x15b   :  { %506 = vperm.xlu0 %613, %v498_v43  }
 0x15c   :  { %48 = vperm.xlu1 %614, %v40_v44  }
 0x17d   :  { %v412_v52 = vpop.permute.xlu2 %411 }
 0x185   :  { %v455_v56 = vpop.permute.xlu2 %454 }
 0x18d   :  { %v333_v62 = vpop.permute.xlu2 %332 }
 0x195   :  { %v323_v53 = vpop.permute.xlu0 %322  ;;  %v369_v1 = vpop.permute.xlu2 %368 }
 0x196   :  { %v331_v54 = vpop.permute.xlu1 %330 }
 0x197   :  { %v334_v2 = vsel %vm120_vm1, %v331_v54, %v323_v53  ;;  %v340_v3 = vsel %vm120_vm1, %v323_v53, %v331_v54 }
 0x198   :  { %v344_v6 = vmul.f32 %v340_v3, %v749_v23  ;;  %v345_v7 = vmul.f32 %v334_v2, %v751_v24 }
 0x19a   :  { %v358_v20 = vmul.f32 %v351_v46, %v344_v6  ;;  %v359_v21 = vmul.f32 %v351_v46, %v345_v7 }
 0x19d   :  { %v367_v55 = vpop.permute.xlu0 %366  ;;  %v414_v28 = vpop.permute.xlu2 %413 }
 0x19e   :  { %v373_v59 = vpop.permute.xlu1 %372 }
 0x19f   :  { %v376_v10 = vsel %vm148_vm2, %v373_v59, %v367_v55  ;;  %v382_v11 = vsel %vm148_vm2, %v367_v55, %v373_v59 }
 0x1a0   :  { %v387_v26 = vmul.f32 %v382_v11, %v766_v35  ;;  %v388_v27 = vmul.f32 %v376_v10, %v768_v36 }
 0x1a2   :  { %v402_v46 = vmul.f32 %v394_v49, %v388_v27 }
 0x1a5   :  { %v375_v60 = vpop.permute.xlu0 %374  ;;  %v480_v11 = vpop.permute.xlu2 %479 }
 0x1a6   :  { %v410_v61 = vpop.permute.xlu1 %409  ;;  %v377_v14 = vsel %vm148_vm2, %v375_v60, %v369_v1  ;;  %v383_v17 = vsel %vm148_vm2, %v369_v1, %v375_v60 }
 0x1a7   :  { %v389_v29 = vmul.f32 %v383_v17, %v766_v35  ;;  %v390_v31 = vmul.f32 %v377_v14, %v768_v36  ;;  %v417_v41 = vsel %vm177_vm3, %v410_v61, %v412_v52  ;;  %v425_v42 = vsel %vm177_vm3, %v412_v52, %v410_v61 }
 0x1a8   :  { %v362_v36 = vadd.f32 %v358_v20, %v316_v32  ;;  %v430_v53 = vmul.f32 %v417_v41, %v770_v37  ;;  %v431_v54 = vmul.f32 %v425_v42, %v772_v38  ;;  %v75_v20 = vpop.f32.mrf.mxu0 }
 0x1ad   :  { %v416_v63 = vpop.permute.xlu0 %415 }
 0x1ae   :  { %v453_v0 = vpop.permute.xlu1 %452  ;;  %v418_v39 = vsel %vm177_vm3, %v414_v28, %v416_v63  ;;  %v426_v40 = vsel %vm177_vm3, %v416_v63, %v414_v28 }
 0x1af   :  { %v432_v22 = vmul.f32 %v418_v39, %v770_v37  ;;  %v433_v25 = vmul.f32 %v426_v40, %v772_v38  ;;  %v460_v52 = vsel %vm207_vm4, %v453_v0, %v455_v56  ;;  %v468_v55 = vsel %vm207_vm4, %v455_v56, %v453_v0 }
 0x1b0   :  { %v473_v38 = vmul.f32 %v460_v52, %v790_v57  ;;  %v474_v3 = vmul.f32 %v468_v55, %v792_v58 }
 0x1b1   :  { %v446_v63 = vmul.f32 %v878_v50, %v432_v22  ;;  %v447_v1 = vmul.f32 %v878_v50, %v433_v25 }
 0x1b2   :  { %v488_v14 = vmul.f32 %v480_v11, %v474_v3 }
 0x1b5   :  { %v457_v4 = vpop.permute.xlu0 %456 }
 0x1b6   :  { %v325_v5 = vpop.permute.xlu1 %324 }
 0x1b7   :  { %v335_v8 = vsel %vm120_vm1, %v333_v62, %v325_v5  ;;  %v341_v9 = vsel %vm120_vm1, %v325_v5, %v333_v62 }
 0x1b8   :  { %v346_v12 = vmul.f32 %v341_v9, %v749_v23  ;;  %v347_v13 = vmul.f32 %v335_v8, %v751_v24  ;;  %v318_v23 = vmul.f32 %v314_v48, %v833_v30  ;;  %v319_v24 = vmul.f32 %v314_v48, %v841_v33 }
 0x1b9   :  { %v401_v30 = vmul.f32 %v394_v49, %v387_v26  ;;  %v403_v33 = vmul.f32 %v399_v47, %v389_v29  ;;  %v404_v48 = vmul.f32 %v399_v47, %v390_v31  ;;  %v502_v26 = vpop.permute.xlu2 %501 }
 0x1ba   :  { %v360_v18 = vmul.f32 %v356_v45, %v346_v12  ;;  %v361_v19 = vmul.f32 %v356_v45, %v347_v13  ;;  %v363_v45 = vadd.f32 %v359_v21, %v317_v34  ;;  %v487_v13 = vmul.f32 %v480_v11, %v473_v38 }
 0x1bb   :  { %v405_v2 = vadd.f32 %v401_v30, %v362_v36 }
 0x1bc   :  { %v364_v43 = vadd.f32 %v360_v18, %v318_v23  ;;  %v365_v35 = vadd.f32 %v361_v19, %v319_v24  ;;  %v406_v37 = vadd.f32 %v402_v46, %v363_v45  ;;  %v98_v19 = vpop.f32.mrf.mxu1 }
 0x1bd   :  { %v437_v51 = vpop.permute.xlu0 %436 }
 0x1be   :  { %v459_v44 = vpop.permute.xlu1 %458  ;;  %v407_v49 = vadd.f32 %v403_v33, %v364_v43  ;;  %v408_v61 = vadd.f32 %v404_v48, %v365_v35  ;;  %v444_v47 = vmul.f32 %v437_v51, %v430_v53  ;;  %v445_v62 = vmul.f32 %v437_v51, %v431_v54 }
 0x1bf   :  { %v461_v59 = vsel %vm207_vm4, %v457_v4, %v459_v44  ;;  %v469_v60 = vsel %vm207_vm4, %v459_v44, %v457_v4 }
 0x1c0   :  { %v475_v56 = vmul.f32 %v461_v59, %v790_v57  ;;  %v476_v0 = vmul.f32 %v469_v60, %v792_v58  ;;  %v450_v4 = vadd.f32 %v446_v63, %v407_v49  ;;  %v451_v6 = vadd.f32 %v447_v1, %v408_v61  ;;  %v495_v57 = vld [vmem:[%s947_s8] sm:$0xff]  ;;  %v496_v58 = vld [vmem:[%s947_s8 + $0x8] sm:$0xff] }
 0x1c1   :  { %v448_v9 = vadd.f32 %v444_v47, %v405_v2  ;;  %v449_v10 = vadd.f32 %v445_v62, %v406_v37 }
 0x1c3   :  { %v491_v17 = vadd.f32 %v487_v13, %v448_v9  ;;  %v492_v18 = vadd.f32 %v488_v14, %v449_v10 }
 0x1c5   :  { %v44_v21 = vpop.permute.xlu0 %43 }
 0x1c6   :  { %v485_v5 = vpop.permute.xlu1 %484  ;;  %v99_v29 = vadd.f32 %v98_v19, %v44_v21  ;;  %v76_v31 = vadd.f32 %v75_v20, %v44_v21 }
 0x1c7   :  { %v489_v7 = vmul.f32 %v485_v5, %v475_v56  ;;  %v490_v8 = vmul.f32 %v485_v5, %v476_v0 }
 0x1c9   :  { %v493_v12 = vadd.f32 %v489_v7, %v450_v4  ;;  %v494_v50 = vadd.f32 %v490_v8, %v451_v6 }
 0x1cb   :  { %530 = vmatpush.msrb.mxu0 %v493_v12  ;;  %553 = vmatpush.msrb.mxu1 %v494_v50 }
 0x1cd   :  { %531 = vmatpush.msrb.mxu0 %v491_v17  ;;  %554 = vmatpush.msrb.mxu1 %v492_v18  ;;  %v507_v42 = vpop.permute.xlu0 %506 }
 0x1ce   :  { %603 = vmatmul.msk.f32.vlgmr.msrb.gmra.mxu1 %vm509_vm5, %v495_v57  ;;  %601 = vmatmul.msk.f32.vlgmr.msrb.gmra.mxu0 %vm509_vm5, %v495_v57  ;;  %v49_v41 = vpop.permute.xlu1 %48 }
 0x1cf   :  { %v79_v44 = vadd.f32 %v808_v15, %v49_v41  ;;  %v102_v36 = vadd.f32 %v810_v16, %v49_v41 }
 0x1d6   :  { %602 = vmatmul.msk.f32.gmra.mxu0 %vm509_vm5, %v496_v58  ;;  %604 = vmatmul.msk.f32.gmra.mxu1 %vm509_vm5, %v496_v58 }
 0x24b   :  { %v533_v27 = vpop.f32.mrf.mxu0  ;;  %v556_v28 = vpop.f32.mrf.mxu1 }
 0x24c   :  { %v534_v23 = vadd.f32 %v533_v27, %v502_v26  ;;  %v557_v24 = vadd.f32 %v556_v28, %v502_v26 }
 0x24e   :  { %v562_v32 = vadd.f32 %v534_v23, %v76_v31  ;;  %v563_v34 = vadd.f32 %v557_v24, %v99_v29 }
 0x250   :  { %v566_v39 = vmax.f32 %v562_v32, 0.0  ;;  %v567_v40 = vmax.f32 %v563_v34, 0.0 }
 0x252   :  { %570 = vst [vmem:[%s948_s10] sm:$0xff] %v566_v39 }
 0x253   :  { %571 = vst [vmem:[%s948_s10 + $0x8] sm:$0xff] %v567_v40  ;;  %v536_v43 = vpop.f32.mrf.mxu0  ;;  %v559_v35 = vpop.f32.mrf.mxu1 }
 0x254   :  { %v537_v45 = vadd.f32 %v536_v43, %v507_v42  ;;  %v560_v30 = vadd.f32 %v559_v35, %v507_v42 }
 0x256   :  { %v564_v46 = vadd.f32 %v537_v45, %v79_v44  ;;  %v565_v33 = vadd.f32 %v560_v30, %v102_v36 }
 0x258   :  { %v568_v48 = vmax.f32 %v564_v46, 0.0  ;;  %v569_v22 = vmax.f32 %v565_v33, 0.0 }
 0x25a   :  { %572 = vst [vmem:[%s948_s10 + $0x10] sm:$0xff] %v568_v48 }
 0x25b   :  { %573 = vst [vmem:[%s948_s10 + $0x18] sm:$0xff] %v569_v22 }

</bundles_post_ra>
